<compile_context>
chip_gen: v5e
topology: v5e:2x2
jax: 0.10.0
libtpu: 0.0.40
codegen_flags: <defaults>
</compile_context>

<pallas_src>
import jax
import jax.numpy as jnp
from jax.experimental import pallas as pl
from jax.experimental.pallas import tpu as pltpu


# ----------------------------- in-kernel math -----------------------------

_ERF_P = 0.3275911
_ERF_A = (0.254829592, -0.284496736, 1.421413741, -1.453152027, 1.061405429)


def _erf_approx_f32(x):
    # Abramowitz & Stegun 7.1.26: |error| <= 1.5e-7 over all x (plus ~1e-4
    # from the approximate reciprocal, still far below test tolerance).
    # Only exp/rcp (EUP) + mul/add/abs/where (VPU), all f32 -> safe on
    # v5e/v6e/v7x without relying on a native erf lowering.
    a1, a2, a3, a4, a5 = _ERF_A
    sign = jnp.where(x < 0.0, -1.0, 1.0)
    ax = jnp.abs(x)
    t = pl.reciprocal(1.0 + _ERF_P * ax, approx=True)     # EUP vrcp
    poly = ((((a5 * t + a4) * t + a3) * t + a2) * t + a1) * t
    return sign * (1.0 - poly * jnp.exp(-(ax * ax)))


def _gelu_exact_f32(x):
    # nn.GELU() default (exact erf GELU).
    return 0.5 * x * (1.0 + _erf_approx_f32(x * 0.7071067811865476))


# ------------------------------ fused kernel ------------------------------

def _ffn_kernel(x_ref, w1_ref, b1_ref, w2_ref, b2_ref, o_ref):
    # One row tile per grid step; weights/biases are whole-array VMEM blocks.
    # ff1 on the MXU (operands already in matmul dtype), f32 accumulation.
    h = jnp.dot(x_ref[...], w1_ref[...],
                preferred_element_type=jnp.float32) + b1_ref[...]

    # exact-erf GELU, kept entirely in VMEM / f32 (EUP exp+rcp, VPU mul/add).
    h = _gelu_exact_f32(h)

    # ff2 on the MXU; the only remaining in-kernel cast is the freshly
    # produced f32 intermediate down to the MXU dtype.
    y = jnp.dot(h.astype(w2_ref.dtype), w2_ref[...],
                preferred_element_type=jnp.float32) + b2_ref[...]

    # TODO(synk): nn.Dropout(p) layers are identity in eval mode; training-mode
    # dropout (PRNG masking) is not implemented.
    o_ref[...] = y.astype(o_ref.dtype)


# ------------------------------ host wrapper -------------------------------

def _cdiv(a, b):
    return -(-a // b)


def _round_up(a, b):
    return _cdiv(a, b) * b


def feedforward_pallas(x, w1, b1, w2, b2, *,
                       matmul_dtype=jnp.bfloat16, out_dtype=jnp.float32):
    """y = GELU(x @ w1 + b1) @ w2 + b2, fused in a single Pallas TPU kernel.

    x: (..., dim).  matmul_dtype controls the MXU operand dtype (bf16 default,
    f32 accumulation either way); pass jnp.float32 for bit-faithful semantics.
    out_dtype controls the written-back dtype (bf16 halves writeback bytes if
    the consumer tolerates it).
    """
    orig_shape = x.shape
    D, H = w1.shape
    D_out = w2.shape[1]

    # Cast MXU operands on the host (removes in-kernel VPU casts, halves DMA).
    x2 = x.reshape(-1, D).astype(matmul_dtype)
    M = x2.shape[0]

    # Row tiling (per perf review):
    #   * m_pad <= 512 -> a single grid step: no per-step overhead, no
    #     pointless 2-way split of tiny batches.
    #   * larger M     -> ~512-row tiles: >= 2 "parallel" steps for v7x's two
    #     TensorCores, step overhead amortized, VMEM footprint tiny.
    m_pad = _round_up(max(M, 8), 8)
    if m_pad <= 512:
        bm = m_pad
    else:
        grid_m = _cdiv(m_pad, 512)
        bm = _round_up(_cdiv(m_pad, grid_m), 16)
    grid_m = _cdiv(m_pad, bm)
    m_pad = grid_m * bm
    if m_pad != M:
        x2 = jnp.pad(x2, ((0, m_pad - M), (0, 0)))

    w1c = w1.astype(matmul_dtype)
    w2c = w2.astype(matmul_dtype)
    b1r = b1.reshape(1, H).astype(jnp.float32)
    b2r = b2.reshape(1, D_out).astype(jnp.float32)

    # TODO(synk): if dim/hidden_dim are scaled up, single-buffer the
    # grid-invariant weight specs (pipeline_mode=pl.Buffered(1)) and set
    # vmem_limit_bytes explicitly to keep headroom on v7x's 64 MiB VMEM.
    # TODO(synk): a lane-dense (m/2, 128) output view would avoid masked
    # vst.msk stores for D_out=64; not applied here without measuring the
    # in-kernel relayout cost.
    out = pl.pallas_call(
        _ffn_kernel,
        out_shape=jax.ShapeDtypeStruct((m_pad, D_out), out_dtype),
        grid=(grid_m,),
        in_specs=[
            pl.BlockSpec((bm, D), lambda i: (i, 0)),       # x row tile
            pl.BlockSpec((D, H), lambda i: (0, 0)),        # W1 (resident)
            pl.BlockSpec((1, H), lambda i: (0, 0)),        # b1
            pl.BlockSpec((H, D_out), lambda i: (0, 0)),    # W2 (resident)
            pl.BlockSpec((1, D_out), lambda i: (0, 0)),    # b2
        ],
        out_specs=pl.BlockSpec((bm, D_out), lambda i: (i, 0)),
        compiler_params=pltpu.CompilerParams(
            dimension_semantics=("parallel",)),
    )(x2, w1c, b1r, w2c, b2r)

    return out[:M].reshape(orig_shape[:-1] + (D_out,))


# ---------------------------------- demo -----------------------------------

if __name__ == "__main__":
    DIM = 64        # matches `dim = 64` in the PyTorch script
    HIDDEN = 128    # hidden_dim (mlp_dim) used by the ViT in the same script
    BATCH, SEQ = 2, 16

    key = jax.random.PRNGKey(0)
    kx, k1, k2, k3, k4 = jax.random.split(key, 5)
    x = jax.random.normal(kx, (BATCH, SEQ, DIM), dtype=jnp.float32)
    w1 = 0.02 * jax.random.normal(k1, (DIM, HIDDEN), dtype=jnp.float32)
    b1 = 0.02 * jax.random.normal(k2, (HIDDEN,), dtype=jnp.float32)
    w2 = 0.02 * jax.random.normal(k3, (HIDDEN, DIM), dtype=jnp.float32)
    b2 = 0.02 * jax.random.normal(k4, (DIM,), dtype=jnp.float32)

    # Default (bf16 MXU operands, f32 accumulation).
    fn_bf16 = jax.jit(feedforward_pallas)
    out_bf16 = fn_bf16(x, w1, b1, w2, b2)
    jax.block_until_ready(out_bf16)

    # f32 MXU operands (bit-faithful semantics path).
    fn_f32 = jax.jit(
        lambda *a: feedforward_pallas(*a, matmul_dtype=jnp.float32))
    out_f32 = fn_f32(x, w1, b1, w2, b2)
    jax.block_until_ready(out_f32)

    # Pure-JAX reference (exact-erf GELU == nn.GELU() default; dropout = id).
    h_ref = jnp.einsum("bsd,dh->bsh", x, w1, precision="highest") + b1
    h_ref = jax.nn.gelu(h_ref, approximate=False)
    y_ref = jnp.einsum("bsh,hd->bsd", h_ref, w2, precision="highest") + b2

    assert out_bf16.shape == (BATCH, SEQ, DIM)
    assert bool(jnp.all(jnp.isfinite(out_bf16)))
    # f32 path: tight agreement with the exact reference.
    assert bool(jnp.allclose(out_f32, y_ref, atol=1e-3, rtol=1e-3))
    # bf16 MXU path: agreement within bf16 operand-rounding error.
    assert bool(jnp.allclose(out_bf16, y_ref, atol=5e-3, rtol=5e-2))
    print("KERNEL_OK")
</pallas_src>

<mosaic_0001>
module attributes {stable_mosaic.version = 11 : i64} {
  func.func @_ffn_kernel(%arg0: i32, %arg1: memref<32x64xbf16, #tpu.memory_space<vmem>>, %arg2: memref<64x128xbf16, #tpu.memory_space<vmem>>, %arg3: memref<1x128xf32, #tpu.memory_space<vmem>>, %arg4: memref<128x64xbf16, #tpu.memory_space<vmem>>, %arg5: memref<1x64xf32, #tpu.memory_space<vmem>>, %arg6: memref<32x64xf32, #tpu.memory_space<vmem>>) attributes {dimension_semantics = [#tpu.dimension_semantics<parallel>], iteration_bounds = array<i64: 1>, scalar_prefetch = 0 : i64, scratch_operands = 0 : i64, tpu.core_type = #tpu.core_type<tc>, window_params = [{transform_indices = @transform_0, window_bounds = array<i64: 32, 64>}, {pipeline_mode = #tpu.pipeline_mode<synchronous>, transform_indices = @transform_1, window_bounds = array<i64: 64, 128>}, {pipeline_mode = #tpu.pipeline_mode<synchronous>, transform_indices = @transform_2, window_bounds = array<i64: 1, 128>}, {pipeline_mode = #tpu.pipeline_mode<synchronous>, transform_indices = @transform_3, window_bounds = array<i64: 128, 64>}, {pipeline_mode = #tpu.pipeline_mode<synchronous>, transform_indices = @transform_4, window_bounds = array<i64: 1, 64>}, {transform_indices = @transform_5, window_bounds = array<i64: 32, 64>}]} {
    %c0 = arith.constant 0 : index
    %c0_0 = arith.constant 0 : index
    %0 = vector.load %arg1[%c0, %c0_0] : memref<32x64xbf16, #tpu.memory_space<vmem>>, vector<32x64xbf16>
    %c0_1 = arith.constant 0 : index
    %c0_2 = arith.constant 0 : index
    %1 = vector.load %arg2[%c0_1, %c0_2] : memref<64x128xbf16, #tpu.memory_space<vmem>>, vector<64x128xbf16>
    %cst = arith.constant dense<0.000000e+00> : vector<32x128xf32>
    %2 = tpu.matmul %0, %1, %cst {dimension_numbers = #tpu.dot_dimension_numbers<[1], [0], [0], [1], [0, 0, 1, 1], [], []>} : vector<32x64xbf16>, vector<64x128xbf16>, vector<32x128xf32> -> vector<32x128xf32>
    %c0_3 = arith.constant 0 : index
    %c0_4 = arith.constant 0 : index
    %3 = vector.load %arg3[%c0_3, %c0_4] : memref<1x128xf32, #tpu.memory_space<vmem>>, vector<1x128xf32>
    %4 = vector.broadcast %3 : vector<1x128xf32> to vector<32x128xf32>
    %5 = arith.addf %2, %4 : vector<32x128xf32>
    %cst_5 = arith.constant 5.000000e-01 : f32
    %6 = vector.broadcast %cst_5 : f32 to vector<32x128xf32>
    %7 = arith.mulf %6, %5 : vector<32x128xf32>
    %cst_6 = arith.constant 0.707106769 : f32
    %8 = vector.broadcast %cst_6 : f32 to vector<32x128xf32>
    %9 = arith.mulf %5, %8 : vector<32x128xf32>
    %cst_7 = arith.constant 0.000000e+00 : f32
    %10 = vector.broadcast %cst_7 : f32 to vector<32x128xf32>
    %11 = arith.cmpf olt, %9, %10 : vector<32x128xf32>
    %cst_8 = arith.constant -1.000000e+00 : f32
    %cst_9 = arith.constant 1.000000e+00 : f32
    %12 = vector.broadcast %cst_8 : f32 to vector<32x128xf32>
    %13 = vector.broadcast %cst_9 : f32 to vector<32x128xf32>
    %14 = arith.select %11, %12, %13 : vector<32x128xi1>, vector<32x128xf32>
    %15 = math.absf %9 : vector<32x128xf32>
    %cst_10 = arith.constant 0.327591091 : f32
    %16 = vector.broadcast %cst_10 : f32 to vector<32x128xf32>
    %17 = arith.mulf %16, %15 : vector<32x128xf32>
    %cst_11 = arith.constant 1.000000e+00 : f32
    %18 = vector.broadcast %cst_11 : f32 to vector<32x128xf32>
    %19 = arith.addf %18, %17 : vector<32x128xf32>
    %20 = tpu.reciprocal %19 {approx = true} : vector<32x128xf32> -> vector<32x128xf32>
    %cst_12 = arith.constant 1.06140542 : f32
    %21 = vector.broadcast %cst_12 : f32 to vector<32x128xf32>
    %22 = arith.mulf %21, %20 : vector<32x128xf32>
    %cst_13 = arith.constant -1.45315206 : f32
    %23 = vector.broadcast %cst_13 : f32 to vector<32x128xf32>
    %24 = arith.addf %22, %23 : vector<32x128xf32>
    %25 = arith.mulf %24, %20 : vector<32x128xf32>
    %cst_14 = arith.constant 1.42141378 : f32
    %26 = vector.broadcast %cst_14 : f32 to vector<32x128xf32>
    %27 = arith.addf %25, %26 : vector<32x128xf32>
    %28 = arith.mulf %27, %20 : vector<32x128xf32>
    %cst_15 = arith.constant -0.284496725 : f32
    %29 = vector.broadcast %cst_15 : f32 to vector<32x128xf32>
    %30 = arith.addf %28, %29 : vector<32x128xf32>
    %31 = arith.mulf %30, %20 : vector<32x128xf32>
    %cst_16 = arith.constant 0.254829586 : f32
    %32 = vector.broadcast %cst_16 : f32 to vector<32x128xf32>
    %33 = arith.addf %31, %32 : vector<32x128xf32>
    %34 = arith.mulf %33, %20 : vector<32x128xf32>
    %35 = arith.mulf %15, %15 : vector<32x128xf32>
    %cst_17 = arith.constant 0.000000e+00 : f32
    %36 = vector.broadcast %cst_17 : f32 to vector<32x128xf32>
    %37 = arith.subf %36, %35 : vector<32x128xf32>
    %38 = math.exp %37 : vector<32x128xf32>
    %39 = arith.mulf %34, %38 : vector<32x128xf32>
    %cst_18 = arith.constant 1.000000e+00 : f32
    %40 = vector.broadcast %cst_18 : f32 to vector<32x128xf32>
    %41 = arith.subf %40, %39 : vector<32x128xf32>
    %42 = arith.mulf %14, %41 : vector<32x128xf32>
    %cst_19 = arith.constant 1.000000e+00 : f32
    %43 = vector.broadcast %cst_19 : f32 to vector<32x128xf32>
    %44 = arith.addf %43, %42 : vector<32x128xf32>
    %45 = arith.mulf %7, %44 : vector<32x128xf32>
    %46 = arith.truncf %45 : vector<32x128xf32> to vector<32x128xbf16>
    %c0_20 = arith.constant 0 : index
    %c0_21 = arith.constant 0 : index
    %47 = vector.load %arg4[%c0_20, %c0_21] : memref<128x64xbf16, #tpu.memory_space<vmem>>, vector<128x64xbf16>
    %cst_22 = arith.constant dense<0.000000e+00> : vector<32x64xf32>
    %48 = tpu.matmul %46, %47, %cst_22 {dimension_numbers = #tpu.dot_dimension_numbers<[1], [0], [0], [1], [0, 0, 1, 1], [], []>} : vector<32x128xbf16>, vector<128x64xbf16>, vector<32x64xf32> -> vector<32x64xf32>
    %c0_23 = arith.constant 0 : index
    %c0_24 = arith.constant 0 : index
    %49 = vector.load %arg5[%c0_23, %c0_24] : memref<1x64xf32, #tpu.memory_space<vmem>>, vector<1x64xf32>
    %50 = vector.broadcast %49 : vector<1x64xf32> to vector<32x64xf32>
    %51 = arith.addf %48, %50 : vector<32x64xf32>
    %c0_25 = arith.constant 0 : index
    %c0_26 = arith.constant 0 : index
    %52 = vector.load %arg6[%c0_25, %c0_26] : memref<32x64xf32, #tpu.memory_space<vmem>>, vector<32x64xf32>
    tpu.vector_store %arg6[%c0_25, %c0_26], %51 {strides = array<i32>} : memref<32x64xf32, #tpu.memory_space<vmem>>, vector<32x64xf32>,
    return
  }
  func.func @transform_0(%arg0: i32) -> (i32, i32) {
    %c0_i32 = arith.constant 0 : i32
    %c0_i32_0 = arith.constant 0 : i32
    return %arg0, %c0_i32 : i32, i32
  }
  func.func @transform_1(%arg0: i32) -> (i32, i32) {
    %c0_i32 = arith.constant 0 : i32
    %c0_i32_0 = arith.constant 0 : i32
    %c0_i32_1 = arith.constant 0 : i32
    return %c0_i32, %c0_i32_0 : i32, i32
  }
  func.func @transform_2(%arg0: i32) -> (i32, i32) {
    %c0_i32 = arith.constant 0 : i32
    %c0_i32_0 = arith.constant 0 : i32
    %c0_i32_1 = arith.constant 0 : i32
    return %c0_i32, %c0_i32_0 : i32, i32
  }
  func.func @transform_3(%arg0: i32) -> (i32, i32) {
    %c0_i32 = arith.constant 0 : i32
    %c0_i32_0 = arith.constant 0 : i32
    %c0_i32_1 = arith.constant 0 : i32
    return %c0_i32, %c0_i32_0 : i32, i32
  }
  func.func @transform_4(%arg0: i32) -> (i32, i32) {
    %c0_i32 = arith.constant 0 : i32
    %c0_i32_0 = arith.constant 0 : i32
    %c0_i32_1 = arith.constant 0 : i32
    return %c0_i32, %c0_i32_0 : i32, i32
  }
  func.func @transform_5(%arg0: i32) -> (i32, i32) {
    %c0_i32 = arith.constant 0 : i32
    %c0_i32_0 = arith.constant 0 : i32
    return %arg0, %c0_i32 : i32, i32
  }
}

</mosaic_0001>

<bundles_post_ra>
// kernel: feedforward_pallas.1
= control target key start
LH: loop header
LB: loop body
LE: loop exit
PB: predicated region body
PF: predicated region fallthrough
CT: control target
= control target key end

     0   :  { %s568_s0 = inlined_call_operand.vmem [shape: bf16[32,64], index: 0, kind: input, shape index: {}]   ;;  %s569_s1 = inlined_call_operand.vmem [shape: bf16[64,128], index: 1, kind: input, shape index: {}]   ;;  %s570_s2 = inlined_call_operand.vmem [shape: f32[1,128], index: 2, kind: input, shape index: {}]   ;;  %s571_s3 = inlined_call_operand.vmem [shape: bf16[128,64], index: 3, kind: input, shape index: {}]   ;;  %s572_s4 = inlined_call_operand.vmem [shape: f32[1,64], index: 4, kind: input, shape index: {}]   ;;  %s573_s5 = inlined_call_operand.hbm [shape: f32[32,64], index: 5, kind: output, shape index: {}]  }
   0x1   :  { %v376_v0 = vld [vmem:[%s569_s1 + $0x18] sm:$0xff]  ;;  %v375_v1 = vld [vmem:[%s569_s1 + $0x10] sm:$0xff] }
   0x2   :  { %83 = vmatpush.bf16.msra.mxu0 %v376_v0  ;;  %385 = vmatpush.bf16.msra.mxu3 %v376_v0 }
   0x3   :  { %10 = vsyncpa [#allocation3], 0  ;;  %v374_v2 = vld [vmem:[%s569_s1 + $0x8] sm:$0xff]  ;;  %v373_v3 = vld [vmem:[%s569_s1] sm:$0xff]  ;;  %vm72_vm0 = vcmask 523264   ;;  %s446_s21 = smov [#allocation2]  }
   0x4   :  { %v371_v4 = vld [vmem:[%s568_s0] sm:$0xff]  ;;  %v372_v5 = vld [vmem:[%s568_s0 + $0x8] sm:$0xff]  ;;  %v384_v6 = vld [vmem:[%s571_s3 + $0x38] sm:$0xff]  ;;  %s299_s22 = sshll.u32 %s446_s21, 4  ;;  %s301_s25 = sshll.u32 %s573_s5, 4  ;;  %s300_s22 = int_to_ptr.vmem [resolvable:$true] %s299_s22  ;;  %s302_s25 = int_to_ptr.hbm [resolvable:$true] %s301_s25 }
   0x5   :  { %272 = vmatpush.bf16.msra.mxu1 %v384_v6  ;;  %389 = vmatpush.bf16.msra.mxu2 %v384_v6  ;;  %v383_v7 = vld [vmem:[%s571_s3 + $0x30] sm:$0xff]  ;;  %v401_v8 = vld [vmem:[%s570_s2] ss:$0 sm:$0xff]  ;;  %v382_v9 = vld [vmem:[%s571_s3 + $0x28] sm:$0xff]  ;;  %s448_s26 = smov 8  }
   0x6   :  { %84 = vmatpush.bf16.msra.mxu0 %v375_v1  ;;  %386 = vmatpush.bf16.msra.mxu3 %v375_v1  ;;  %v381_v12 = vld [vmem:[%s571_s3 + $0x20] sm:$0xff]  ;;  %v380_v16 = vld [vmem:[%s571_s3 + $0x18] sm:$0xff]  ;;  %v379_v23 = vld [vmem:[%s571_s3 + $0x10] sm:$0xff] }
   0x7   :  { %v378_v29 = vld [vmem:[%s571_s3 + $0x8] sm:$0xff]  ;;  %v377_v37 = vld [vmem:[%s571_s3] sm:$0xff] }
   0x9   :  { %273 = vmatpush.bf16.msra.mxu1 %v383_v7  ;;  %390 = vmatpush.bf16.msra.mxu2 %v383_v7 }
   0xa   :  { %85 = vmatpush.bf16.msra.mxu0 %v374_v2  ;;  %387 = vmatpush.bf16.msra.mxu3 %v374_v2 }
   0xd   :  { %274 = vmatpush.bf16.msra.mxu1 %v382_v9  ;;  %391 = vmatpush.bf16.msra.mxu2 %v382_v9 }
   0xe   :  { %86 = vmatpush.bf16.msra.mxu0 %v373_v3  ;;  %388 = vmatpush.bf16.msra.mxu3 %v373_v3 }
  0x11   :  { %337 = vmatmul.msk.bf16.vlgmr.msra.gmra.mxu0 %vm72_vm0, %v371_v4  ;;  %338 = vmatmul.msk.bf16.vlgmr.msra.gmra.mxu3 %vm72_vm0, %v372_v5 }
  0x12   :  { %275 = vmatpush.bf16.msra.mxu1 %v381_v12  ;;  %392 = vmatpush.bf16.msra.mxu2 %v381_v12 }
  0x16   :  { %276 = vmatpush.bf16.msra.mxu1 %v380_v16  ;;  %393 = vmatpush.bf16.msra.mxu2 %v380_v16 }
  0x1a   :  { %277 = vmatpush.bf16.msra.mxu1 %v379_v23  ;;  %394 = vmatpush.bf16.msra.mxu2 %v379_v23 }
  0x1e   :  { %278 = vmatpush.bf16.msra.mxu1 %v378_v29  ;;  %395 = vmatpush.bf16.msra.mxu2 %v378_v29 }
  0x22   :  { %279 = vmatpush.bf16.msra.mxu1 %v377_v37  ;;  %396 = vmatpush.bf16.msra.mxu2 %v377_v37 }
  0x8e   :  { %v88_v10 = vpop.f32.mrf.mxu0 }
  0x8f   :  { %v511_v11 = vadd.f32 %v401_v8, %v88_v10 }
  0x91   :  { %v517_v13 = vmul.f32 0.70710677, %v511_v11 }
  0x93   :  { %v114_v14 = vand.u32 2147483647, %v517_v13  ;;  %vm106_vm1 = vcmp.lt.f32.partialorder %v517_v13, 0.0 }
  0x94   :  { %v93_v15 = vpop.f32.mrf.mxu3 }
  0x95   :  { %v118_v17 = vmul.f32 0.3275911, %v114_v14  ;;  %v523_v18 = vadd.f32 %v401_v8, %v93_v15  ;;  %v166_v35 = vmul.f32 %v114_v14, %v114_v14 }
  0x96   :  { %v90_v19 = vpop.f32.mrf.mxu0 }
  0x97   :  { %v122_v20 = vadd.f32 1.0, %v118_v17  ;;  %v526_v21 = vmul.f32 0.70710677, %v523_v18  ;;  %v528_v22 = vadd.f32 %v401_v8, %v90_v19  ;;  %v170_v42 = vsub.f32 0.0, %v166_v35 }
  0x99   :  { %403 = vrcp.f32 %v122_v20  ;;  %v116_v24 = vand.u32 2147483647, %v526_v21  ;;  %v535_v25 = vmul.f32 0.70710677, %v528_v22  ;;  %v174_v50 = vmul.f32 1.442695, %v170_v42 }
  0x9a   :  { %vm108_vm3 = vcmp.lt.f32.partialorder %v526_v21, 0.0 }
  0x9b   :  { %v120_v26 = vmul.f32 0.3275911, %v116_v24  ;;  %v115_v27 = vand.u32 2147483647, %v535_v25  ;;  %v168_v45 = vmul.f32 %v116_v24, %v116_v24  ;;  %vm107_vm2 = vcmp.lt.f32.partialorder %v535_v25, 0.0 }
  0x9c   :  { %v95_v28 = vpop.f32.mrf.mxu3  ;;  %v99_v25 = vmul.f32 0.5, %v528_v22 }
  0x9d   :  { %v124_v30 = vadd.f32 1.0, %v120_v26  ;;  %v541_v31 = vadd.f32 %v401_v8, %v95_v28  ;;  %v119_v32 = vmul.f32 0.3275911, %v115_v27  ;;  %v167_v51 = vmul.f32 %v115_v27, %v115_v27 }
  0x9e   :  { %v172_v54 = vsub.f32 0.0, %v168_v45 }
  0x9f   :  { %v404_v33 = vpop.eup %403  ;;  %405 = vrcp.f32 %v124_v30  ;;  %v544_v34 = vmul.f32 0.70710677, %v541_v31  ;;  %v123_v36 = vadd.f32 1.0, %v119_v32  ;;  %v171_v59 = vsub.f32 0.0, %v167_v51 }
  0xa0   :  { %v130_v38 = vmul.f32 1.0614054, %v404_v33  ;;  %v178_v63 = vmul.f32 1.442695, %v172_v54 }
  0xa1   :  { %v117_v39 = vand.u32 2147483647, %v544_v34  ;;  %407 = vrcp.f32 %v123_v36  ;;  %v176_v6 = vmul.f32 1.442695, %v171_v59  ;;  %vm109_vm4 = vcmp.lt.f32.partialorder %v544_v34, 0.0 }
  0xa2   :  { %v134_v40 = vadd.f32 -1.4531521, %v130_v38  ;;  %v445_v38 = vmov 1.0  }
  0xa3   :  { %v121_v41 = vmul.f32 0.3275911, %v117_v39  ;;  %v169_v0 = vmul.f32 %v117_v39, %v117_v39  ;;  %v110_v39 = vsel %vm106_vm1, -1.0, %v445_v38  ;;  %v111_v13 = vsel %vm107_vm2, -1.0, %v445_v38 }
  0xa4   :  { %v138_v43 = vmul.f32 %v404_v33, %v134_v40  ;;  %v113_v21 = vsel %vm109_vm4, -1.0, %v445_v38 }
  0xa5   :  { %v406_v44 = vpop.eup %405  ;;  %v125_v46 = vadd.f32 1.0, %v121_v41  ;;  %v173_v10 = vsub.f32 0.0, %v169_v0 }
  0xa6   :  { %v142_v47 = vadd.f32 1.4214138, %v138_v43  ;;  %v132_v48 = vmul.f32 1.0614054, %v406_v44 }
  0xa7   :  { %409 = vrcp.f32 %v125_v46  ;;  %v408_v49 = vpop.eup %407  ;;  %v180_v24 = vmul.f32 1.442695, %v173_v10 }
  0xa8   :  { %v146_v52 = vmul.f32 %v404_v33, %v142_v47  ;;  %v136_v53 = vadd.f32 -1.4531521, %v132_v48  ;;  %v131_v55 = vmul.f32 1.0614054, %v408_v49  ;;  %411 = vpow2.f32 %v174_v50 }
  0xa9   :  { %413 = vpow2.f32 %v178_v63  ;;  %v112_v48 = vsel %vm108_vm3, -1.0, %v445_v38 }
  0xaa   :  { %v150_v56 = vadd.f32 -0.28449672, %v146_v52  ;;  %v140_v57 = vmul.f32 %v406_v44, %v136_v53  ;;  %v135_v58 = vadd.f32 -1.4531521, %v131_v55  ;;  %415 = vpow2.f32 %v176_v6 }
  0xab   :  { %417 = vpow2.f32 %v180_v24  ;;  %v98_v53 = vmul.f32 0.5, %v511_v11  ;;  %v402_v11 = vld [vmem:[%s572_s4] ss:$0 sm:$0xff]  ;;  %s447_s4 = smov 128  }
  0xac   :  { %v154_v60 = vmul.f32 %v404_v33, %v150_v56  ;;  %v144_v61 = vadd.f32 1.4214138, %v140_v57  ;;  %v139_v1 = vmul.f32 %v408_v49, %v135_v58 }
  0xad   :  { %v410_v62 = vpop.eup %409 }
  0xae   :  { %v158_v2 = vadd.f32 0.2548296, %v154_v60  ;;  %v133_v3 = vmul.f32 1.0614054, %v410_v62  ;;  %v148_v4 = vmul.f32 %v406_v44, %v144_v61  ;;  %v143_v5 = vadd.f32 1.4214138, %v139_v1  ;;  %v412_v14 = vpop.eup %411 }
  0xaf   :  { %v414_v29 = vpop.eup %413  ;;  %v100_v61 = vmul.f32 0.5, %v523_v18 }
  0xb0   :  { %v162_v7 = vmul.f32 %v404_v33, %v158_v2  ;;  %v137_v8 = vadd.f32 -1.4531521, %v133_v3  ;;  %v152_v9 = vadd.f32 -0.28449672, %v148_v4  ;;  %v147_v12 = vmul.f32 %v408_v49, %v143_v5  ;;  %v416_v37 = vpop.eup %415 }
  0xb1   :  { %v418_v47 = vpop.eup %417 }
  0xb2   :  { %v141_v15 = vmul.f32 %v410_v62, %v137_v8  ;;  %v156_v16 = vmul.f32 %v406_v44, %v152_v9  ;;  %v151_v17 = vadd.f32 -0.28449672, %v147_v12  ;;  %v182_v19 = vmul.f32 %v412_v14, %v162_v7 }
  0xb4   :  { %v145_v20 = vadd.f32 1.4214138, %v141_v15  ;;  %v160_v23 = vadd.f32 0.2548296, %v156_v16  ;;  %v155_v26 = vmul.f32 %v408_v49, %v151_v17  ;;  %v186_v32 = vsub.f32 1.0, %v182_v19 }
  0xb6   :  { %v149_v27 = vmul.f32 %v410_v62, %v145_v20  ;;  %v164_v28 = vmul.f32 %v406_v44, %v160_v23  ;;  %v159_v30 = vadd.f32 0.2548296, %v155_v26  ;;  %v190_v42 = vmul.f32 %v186_v32, %v110_v39 }
  0xb8   :  { %v153_v33 = vadd.f32 -0.28449672, %v149_v27  ;;  %v184_v35 = vmul.f32 %v414_v29, %v164_v28  ;;  %v163_v36 = vmul.f32 %v408_v49, %v159_v30  ;;  %v194_v51 = vadd.f32 1.0, %v190_v42 }
  0xba   :  { %v157_v40 = vmul.f32 %v410_v62, %v153_v33  ;;  %v183_v41 = vmul.f32 %v416_v37, %v163_v36  ;;  %v188_v44 = vsub.f32 1.0, %v184_v35  ;;  %v198_v56 = vmul.f32 %v194_v51, %v98_v53 }
  0xbc   :  { %v161_v43 = vadd.f32 0.2548296, %v157_v40  ;;  %v187_v45 = vsub.f32 1.0, %v183_v41  ;;  %v192_v52 = vmul.f32 %v188_v44, %v112_v48 }
  0xbe   :  { %v165_v46 = vmul.f32 %v410_v62, %v161_v43  ;;  %v191_v50 = vmul.f32 %v187_v45, %v111_v13  ;;  %v196_v59 = vadd.f32 1.0, %v192_v52  ;;  %v101_v62 = vmul.f32 0.5, %v541_v31 }
  0xc0   :  { %v185_v49 = vmul.f32 %v418_v47, %v165_v46  ;;  %v195_v54 = vadd.f32 1.0, %v191_v50  ;;  %v200_v34 = vmul.f32 %v196_v59, %v100_v61 }
  0xc2   :  { %v189_v55 = vsub.f32 1.0, %v185_v49  ;;  %v199_v57 = vmul.f32 %v195_v54, %v99_v25 }
  0xc4   :  { %v193_v58 = vmul.f32 %v189_v55, %v113_v21  ;;  %v202_v60 = vpack.c.bf16 %v199_v57, %v198_v56 }
  0xc6   :  { %v197_v63 = vadd.f32 1.0, %v193_v58  ;;  %280 = vmatmul.bf16.vlgmr.msra.gmra.mxu1 %v202_v60 }
  0xc8   :  { %v201_v0 = vmul.f32 %v197_v63, %v101_v62 }
  0xca   :  { %v203_v1 = vpack.c.bf16 %v201_v0, %v200_v34 }
  0xcc   :  { %285 = vmatmul.bf16.vlgmr.msra.gmra.mxu2 %v203_v1 }
 0x143   :  { %v281_v22 = vpop.f32.mrf.mxu1 }
 0x144   :  { %v282_v2 = vadd.f32 %v402_v11, %v281_v22 }
 0x146   :  { %291 = vst.msk [vmem:[#allocation2] sm:$0xff] %vm72_vm0, %v282_v2 }
 0x14b   :  { %v283_v3 = vpop.f32.mrf.mxu1 }
 0x14c   :  { %v284_v4 = vadd.f32 %v402_v11, %v283_v3 }
 0x14e   :  { %292 = vst.msk [vmem:[#allocation2 + $0x8] sm:$0xff] %vm72_vm0, %v284_v4 }
 0x14f   :  { %v286_v18 = vpop.f32.mrf.mxu2 }
 0x150   :  { %v287_v31 = vadd.f32 %v402_v11, %v286_v18 }
 0x152   :  { %293 = vst.msk [vmem:[#allocation2 + $0x10] sm:$0xff] %vm72_vm0, %v287_v31 }
 0x157   :  { %v288_v5 = vpop.f32.mrf.mxu2 }
 0x158   :  { %v289_v6 = vadd.f32 %v402_v11, %v288_v5 }
 0x15a   :  { %294 = vst.msk [vmem:[#allocation2 + $0x18] sm:$0xff] %vm72_vm0, %v289_v6 }
 0x15b   :  { %307 = dma.vmem_to_hbm [thread:$0]  %s300_s22, 512, %s302_s25, [#allocation3], %s447_s4, %s447_s4, %s448_s26  }
 0x15c   :  { %443 = dma.done.wait [#allocation3], 512  }
 0x15d   :  { %444 = vsyncadd [#allocation3], 4294966784 }
 0x15e   :  { %312 = vsyncpa [#allocation3], 1 }

</bundles_post_ra>
